<compile_context>
chip_gen: v5e
topology: v5e:2x2
jax: 0.10.0
libtpu: 0.0.40
codegen_flags: <defaults>
</compile_context>

<pallas_src>
import math

import jax
import jax.numpy as jnp
from jax.experimental import pallas as pl
from jax.experimental.pallas import tpu as pltpu


DELTA_PAD = 128  # bbox layer-3 weight padded to one full MXU / lane group


def _round_up(x, m):
    return ((x + m - 1) // m) * m


def _choose_tile_rows(M, tm_max=1024):
    """Row tile: multiple of 32 (bf16 intermediates pack 2 rows/sublane), as large
    as useful; even tile count >= 2 when there is enough work so the "parallel"
    grid axis splits evenly across v7x's two TensorCores."""
    if M <= 128:
        return _round_up(M, 8)
    n_tiles = max(2, pl.cdiv(M, tm_max))
    if n_tiles % 2:
        n_tiles += 1
    return _round_up(pl.cdiv(M, n_tiles), 32)


# -----------------------------------------------------------------------------
# Pallas kernels
# -----------------------------------------------------------------------------
def _dec_head_kernel(hs_ref, ref_ref,
                     w1_ref, b1_ref, w2_ref, b2_ref, w3_ref, b3_ref,
                     wc_ref, bc_ref,
                     coord_ref, logits_ref):
    """bbox MLP (Linear->ReLU->Linear->ReLU->Linear) + sigmoid(delta + ref) +
    class head for decoder rows.  hs arrives f32 and is cast to bf16 here."""
    x = hs_ref[...].astype(jnp.bfloat16)                                   # [tm, D]

    h1 = jnp.maximum(
        jnp.dot(x, w1_ref[...], preferred_element_type=jnp.float32) + b1_ref[...],
        0.0).astype(jnp.bfloat16)
    h2 = jnp.maximum(
        jnp.dot(h1, w2_ref[...], preferred_element_type=jnp.float32) + b2_ref[...],
        0.0).astype(jnp.bfloat16)

    # layer 3: weight zero-padded to 128 output lanes (one clean MXU N-pass);
    # only the first 4 lanes are real.
    delta = jnp.dot(h2, w3_ref[...], preferred_element_type=jnp.float32)  # [tm, 128]
    coord = jax.nn.sigmoid(delta[:, :4] + b3_ref[...] + ref_ref[...])     # [tm, 4]
    coord_ref[...] = coord.astype(coord_ref.dtype)

    # class head (lane-dense C_pad output; padding lanes sliced off in the wrapper)
    logits_ref[...] = (
        jnp.dot(x, wc_ref[...], preferred_element_type=jnp.float32) + bc_ref[...]
    ).astype(logits_ref.dtype)


def _enc_class_kernel(hs_ref, wc_ref, bc_ref, logits_ref):
    """Class head only, for encoder-proposal rows (no bbox MLP, no coord output)."""
    x = hs_ref[...].astype(jnp.bfloat16)
    logits_ref[...] = (
        jnp.dot(x, wc_ref[...], preferred_element_type=jnp.float32) + bc_ref[...]
    ).astype(logits_ref.dtype)


# -----------------------------------------------------------------------------
# One-time weight preparation (cache across forward steps)
# -----------------------------------------------------------------------------
def prepare_head_weights(params):
    D = params["w1"].shape[0]
    C = params["wc"].shape[1]
    C_pad = _round_up(C, 128)
    w3 = jnp.zeros((D, DELTA_PAD), jnp.bfloat16).at[:, :4].set(
        params["w3"].astype(jnp.bfloat16))
    wc = jnp.zeros((D, C_pad), jnp.bfloat16).at[:, :C].set(
        params["wc"].astype(jnp.bfloat16))
    bc = jnp.zeros((1, C_pad), jnp.float32).at[:, :C].set(
        params["bc"].reshape(1, C).astype(jnp.float32))
    return {
        "w1": params["w1"].astype(jnp.bfloat16),
        "b1": params["b1"].reshape(1, D).astype(jnp.float32),
        "w2": params["w2"].astype(jnp.bfloat16),
        "b2": params["b2"].reshape(1, D).astype(jnp.float32),
        "w3": w3,
        "b3": params["b3"].reshape(1, 4).astype(jnp.float32),
        "wc": wc,
        "bc": bc,
        "num_classes": C,
    }


# -----------------------------------------------------------------------------
# pallas_call wrappers
# -----------------------------------------------------------------------------
def detr_decoder_heads(hs_rows, ref_rows, w, *, tm_max=1024):
    """hs_rows [M, D] (original dtype/layout), ref_rows [M, 4] f32
    -> (coord [M, 4] f32, logits [M, C_pad] f32)."""
    M, D = hs_rows.shape
    C_pad = w["wc"].shape[1]
    tm = _choose_tile_rows(M, tm_max)
    n_tiles = pl.cdiv(M, tm)

    def rows(cols):
        return pl.BlockSpec((tm, cols), lambda i: (i, 0))

    def const(shape):
        # Constant block index -> fetched once; small enough that default
        # buffering costs <1 MiB of VMEM.
        return pl.BlockSpec(shape, lambda i: (0, 0))

    weight_bytes = 2 * (2 * D * D + D * (DELTA_PAD + C_pad)) + 4 * (2 * D + 4 + C_pad)
    cost = pl.CostEstimate(
        flops=2 * M * D * (2 * D + DELTA_PAD + C_pad),
        transcendentals=4 * M,  # sigmoid
        bytes_accessed=(M * D * hs_rows.dtype.itemsize   # hs read
                        + M * 4 * 4                      # ref read
                        + weight_bytes
                        + M * (4 + C_pad) * 4))          # outputs

    coord, logits = pl.pallas_call(
        _dec_head_kernel,
        out_shape=(jax.ShapeDtypeStruct((M, 4), jnp.float32),
                   jax.ShapeDtypeStruct((M, C_pad), jnp.float32)),
        grid_spec=pltpu.PrefetchScalarGridSpec(
            num_scalar_prefetch=0,
            grid=(n_tiles,),
            in_specs=[
                rows(D),                                # hs rows (cast in-kernel)
                rows(4),                                # ref rows, un-padded
                const((D, D)), const((1, D)),           # bbox layer 1
                const((D, D)), const((1, D)),           # bbox layer 2
                const((D, DELTA_PAD)), const((1, 4)),   # bbox layer 3
                const((D, C_pad)), const((1, C_pad)),   # class head
            ],
            out_specs=[rows(4), rows(C_pad)],
        ),
        compiler_params=pltpu.CompilerParams(
            dimension_semantics=("parallel",),
            vmem_limit_bytes=32 * 1024 * 1024),
        cost_estimate=cost,
    )(hs_rows, ref_rows, w["w1"], w["b1"], w["w2"], w["b2"],
      w["w3"], w["b3"], w["wc"], w["bc"])
    return coord, logits


def detr_enc_class_head(hs_rows, w, *, tm_max=1024):
    """hs_rows [M, D] -> logits [M, C_pad] f32 (class head only)."""
    M, D = hs_rows.shape
    C_pad = w["wc"].shape[1]
    tm = _choose_tile_rows(M, tm_max)
    n_tiles = pl.cdiv(M, tm)

    cost = pl.CostEstimate(
        flops=2 * M * D * C_pad,
        transcendentals=0,
        bytes_accessed=(M * D * hs_rows.dtype.itemsize
                        + 2 * D * C_pad + 4 * C_pad + M * C_pad * 4))

    return pl.pallas_call(
        _enc_class_kernel,
        out_shape=jax.ShapeDtypeStruct((M, C_pad), jnp.float32),
        grid_spec=pltpu.PrefetchScalarGridSpec(
            num_scalar_prefetch=0,
            grid=(n_tiles,),
            in_specs=[pl.BlockSpec((tm, D), lambda i: (i, 0)),
                      pl.BlockSpec((D, C_pad), lambda i: (0, 0)),
                      pl.BlockSpec((1, C_pad), lambda i: (0, 0))],
            out_specs=pl.BlockSpec((tm, C_pad), lambda i: (i, 0)),
        ),
        compiler_params=pltpu.CompilerParams(
            dimension_semantics=("parallel",),
            vmem_limit_bytes=32 * 1024 * 1024),
        cost_estimate=cost,
    )(hs_rows, w["wc"], w["bc"])


# -----------------------------------------------------------------------------
# LWDETR head forward
# -----------------------------------------------------------------------------
def lwdetr_forward_heads(hs, ref_unsigmoid, hs_enc, prepared):
    """Replicates the LWDETR head math.

    hs:            [L, B, Q, D]  decoder hidden states (from transformer)
    ref_unsigmoid: [L, B, Q, 4]  reference points (unsigmoided)
    hs_enc:        [B, Q, D]     encoder proposal features (two-stage)
    prepared:      output of prepare_head_weights (cached across steps)
    """
    L, B, Q, D = hs.shape
    C = prepared["num_classes"]
    M_dec = L * B * Q

    # reshape-to-rows is a free view; no concat / cast / pad of hs on the wrapper side
    coord, logits = detr_decoder_heads(
        hs.reshape(M_dec, D),
        ref_unsigmoid.reshape(M_dec, 4).astype(jnp.float32),
        prepared)
    outputs_coord = coord.reshape(L, B, Q, 4)
    outputs_class = logits[:, :C].reshape(L, B, Q, C)

    # enc_out_class_embed[0] is a deepcopy of class_embed at init -> shared weights.
    cls_enc = detr_enc_class_head(hs_enc.reshape(B * Q, D), prepared)[:, :C]
    cls_enc = cls_enc.reshape(B, Q, C)

    # TODO(synk): Hungarian matching (scipy linear_sum_assignment), AVA box
    # post-processing / rescaling / cropping, and the external backbone /
    # transformer / temporal backbone have no Pallas equivalent; `pred_boxes`
    # here is outputs_coord[-1] rather than matched/rescaled boxes, and
    # `pred_actions` from the temporal backbone is omitted.
    out = {
        "pred_logits": outputs_class[-1],
        "pred_boxes": outputs_coord[-1],
        "enc_outputs": {"pred_logits": cls_enc},
    }
    return out, outputs_class, outputs_coord


# -----------------------------------------------------------------------------
# Parameter construction (deterministic, mirrors LWDETR.__init__)
# -----------------------------------------------------------------------------
def init_lwdetr_head_params(key, hidden_dim, num_classes):
    k1, k2, kc = jax.random.split(key, 3)
    prior_prob = 0.01
    bias_value = -math.log((1.0 - prior_prob) / prior_prob)
    return {
        # bbox_embed = MLP(hidden, hidden, 4, 3); weights stored as [in, out]
        "w1": jax.random.normal(k1, (hidden_dim, hidden_dim), jnp.float32) * 0.02,
        "b1": jnp.zeros((1, hidden_dim), jnp.float32),
        "w2": jax.random.normal(k2, (hidden_dim, hidden_dim), jnp.float32) * 0.02,
        "b2": jnp.zeros((1, hidden_dim), jnp.float32),
        # nn.init.constant_(bbox_embed.layers[-1].weight/bias, 0)
        "w3": jnp.zeros((hidden_dim, 4), jnp.float32),
        "b3": jnp.zeros((1, 4), jnp.float32),
        # class_embed = Linear(hidden, num_classes); bias = -log((1-p)/p)
        "wc": jax.random.normal(kc, (hidden_dim, num_classes), jnp.float32) * 0.02,
        "bc": jnp.full((1, num_classes), bias_value, jnp.float32),
    }


# -----------------------------------------------------------------------------
# References for correctness checks
# -----------------------------------------------------------------------------
def _ref_heads_bf16(hs, ref, hs_enc, p):
    """Mirrors the kernel's recipe: bf16 MXU operands, f32 accumulation/elementwise."""
    bf, f32 = jnp.bfloat16, jnp.float32
    x = hs.astype(bf)
    h1 = jnp.maximum(jnp.dot(x, p["w1"].astype(bf), preferred_element_type=f32)
                     + p["b1"][0], 0.0).astype(bf)
    h2 = jnp.maximum(jnp.dot(h1, p["w2"].astype(bf), preferred_element_type=f32)
                     + p["b2"][0], 0.0).astype(bf)
    delta = jnp.dot(h2, p["w3"].astype(bf), preferred_element_type=f32) + p["b3"][0]
    coord = jax.nn.sigmoid(delta + ref)
    logits = jnp.dot(x, p["wc"].astype(bf), preferred_element_type=f32) + p["bc"][0]
    cls_enc = (jnp.dot(hs_enc.astype(bf), p["wc"].astype(bf),
                       preferred_element_type=f32) + p["bc"][0])
    return coord, logits, cls_enc


def _ref_heads_f32(hs, ref, hs_enc, p):
    """Plain f32 reference (matches the PyTorch heads up to matmul precision)."""
    h1 = jax.nn.relu(jnp.dot(hs, p["w1"]) + p["b1"][0])
    h2 = jax.nn.relu(jnp.dot(h1, p["w2"]) + p["b2"][0])
    delta = jnp.dot(h2, p["w3"]) + p["b3"][0]
    coord = jax.nn.sigmoid(delta + ref)
    logits = jnp.dot(hs, p["wc"]) + p["bc"][0]
    cls_enc = jnp.dot(hs_enc, p["wc"]) + p["bc"][0]
    return coord, logits, cls_enc


# -----------------------------------------------------------------------------
if __name__ == "__main__":
    # Small shapes consistent with the forward pass.
    L = 2            # decoder layers (hs leading dim)
    B = 2            # batch
    Q = 8            # num_queries
    D = 32           # transformer.d_model (hidden_dim)
    C = 4            # num_classes

    key = jax.random.PRNGKey(0)
    k_hs, k_ref, k_enc, k_par = jax.random.split(key, 4)

    hs = jax.random.normal(k_hs, (L, B, Q, D), jnp.float32)
    ref_unsigmoid = jax.random.normal(k_ref, (L, B, Q, 4), jnp.float32)
    hs_enc = jax.random.normal(k_enc, (B, Q, D), jnp.float32)

    params = init_lwdetr_head_params(k_par, D, C)
    prepared = prepare_head_weights(params)   # one-time weight prep, cached

    out, outputs_class, outputs_coord = lwdetr_forward_heads(
        hs, ref_unsigmoid, hs_enc, prepared)
    jax.block_until_ready((out, outputs_class, outputs_coord))

    # Check 1: against a jnp reference using the same bf16-matmul / f32-elementwise recipe.
    coord_r, logits_r, cls_enc_r = _ref_heads_bf16(hs, ref_unsigmoid, hs_enc, params)
    assert jnp.allclose(outputs_coord, coord_r, atol=1e-4, rtol=1e-4)
    assert jnp.allclose(outputs_class, logits_r, atol=1e-4, rtol=1e-4)
    assert jnp.allclose(out["enc_outputs"]["pred_logits"], cls_enc_r,
                        atol=1e-4, rtol=1e-4)

    # Check 2 (loose): against a pure-f32 reference; bf16 MXU operands are an
    # intentional precision trade-off vs. the f32 PyTorch heads.
    coord_f, logits_f, cls_enc_f = _ref_heads_f32(hs, ref_unsigmoid, hs_enc, params)
    assert jnp.allclose(outputs_coord, coord_f, atol=1e-2, rtol=1e-2)
    assert jnp.allclose(outputs_class, logits_f, atol=2e-2, rtol=2e-2)
    assert jnp.allclose(out["enc_outputs"]["pred_logits"], cls_enc_f,
                        atol=2e-2, rtol=2e-2)

    print("KERNEL_OK")
</pallas_src>

<mosaic_0001>
module attributes {stable_mosaic.version = 11 : i64} {
  func.func @_dec_head_kernel(%arg0: i32, %arg1: memref<32x32xf32, #tpu.memory_space<vmem>>, %arg2: memref<32x4xf32, #tpu.memory_space<vmem>>, %arg3: memref<32x32xbf16, #tpu.memory_space<vmem>>, %arg4: memref<1x32xf32, #tpu.memory_space<vmem>>, %arg5: memref<32x32xbf16, #tpu.memory_space<vmem>>, %arg6: memref<1x32xf32, #tpu.memory_space<vmem>>, %arg7: memref<32x128xbf16, #tpu.memory_space<vmem>>, %arg8: memref<1x4xf32, #tpu.memory_space<vmem>>, %arg9: memref<32x128xbf16, #tpu.memory_space<vmem>>, %arg10: memref<1x128xf32, #tpu.memory_space<vmem>>, %arg11: memref<32x4xf32, #tpu.memory_space<vmem>>, %arg12: memref<32x128xf32, #tpu.memory_space<vmem>>) attributes {dimension_semantics = [#tpu.dimension_semantics<parallel>], iteration_bounds = array<i64: 1>, scalar_prefetch = 0 : i64, scratch_operands = 0 : i64, tpu.core_type = #tpu.core_type<tc>, window_params = [{transform_indices = @transform_0, window_bounds = array<i64: 32, 32>}, {transform_indices = @transform_1, window_bounds = array<i64: 32, 4>}, {pipeline_mode = #tpu.pipeline_mode<synchronous>, transform_indices = @transform_2, window_bounds = array<i64: 32, 32>}, {pipeline_mode = #tpu.pipeline_mode<synchronous>, transform_indices = @transform_3, window_bounds = array<i64: 1, 32>}, {pipeline_mode = #tpu.pipeline_mode<synchronous>, transform_indices = @transform_4, window_bounds = array<i64: 32, 32>}, {pipeline_mode = #tpu.pipeline_mode<synchronous>, transform_indices = @transform_5, window_bounds = array<i64: 1, 32>}, {pipeline_mode = #tpu.pipeline_mode<synchronous>, transform_indices = @transform_6, window_bounds = array<i64: 32, 128>}, {pipeline_mode = #tpu.pipeline_mode<synchronous>, transform_indices = @transform_7, window_bounds = array<i64: 1, 4>}, {pipeline_mode = #tpu.pipeline_mode<synchronous>, transform_indices = @transform_8, window_bounds = array<i64: 32, 128>}, {pipeline_mode = #tpu.pipeline_mode<synchronous>, transform_indices = @transform_9, window_bounds = array<i64: 1, 128>}, {transform_indices = @transform_10, window_bounds = array<i64: 32, 4>}, {transform_indices = @transform_11, window_bounds = array<i64: 32, 128>}]} {
    %c0 = arith.constant 0 : index
    %c0_0 = arith.constant 0 : index
    %0 = vector.load %arg1[%c0, %c0_0] : memref<32x32xf32, #tpu.memory_space<vmem>>, vector<32x32xf32>
    %1 = arith.truncf %0 : vector<32x32xf32> to vector<32x32xbf16>
    %c0_1 = arith.constant 0 : index
    %c0_2 = arith.constant 0 : index
    %2 = vector.load %arg3[%c0_1, %c0_2] : memref<32x32xbf16, #tpu.memory_space<vmem>>, vector<32x32xbf16>
    %cst = arith.constant dense<0.000000e+00> : vector<32x32xf32>
    %3 = tpu.matmul %1, %2, %cst {dimension_numbers = #tpu.dot_dimension_numbers<[1], [0], [0], [1], [0, 0, 1, 1], [], []>} : vector<32x32xbf16>, vector<32x32xbf16>, vector<32x32xf32> -> vector<32x32xf32>
    %c0_3 = arith.constant 0 : index
    %c0_4 = arith.constant 0 : index
    %4 = vector.load %arg4[%c0_3, %c0_4] : memref<1x32xf32, #tpu.memory_space<vmem>>, vector<1x32xf32>
    %5 = vector.broadcast %4 : vector<1x32xf32> to vector<32x32xf32>
    %6 = arith.addf %3, %5 : vector<32x32xf32>
    %cst_5 = arith.constant 0.000000e+00 : f32
    %7 = vector.broadcast %cst_5 : f32 to vector<32x32xf32>
    %8 = arith.maximumf %6, %7 : vector<32x32xf32>
    %9 = arith.truncf %8 : vector<32x32xf32> to vector<32x32xbf16>
    %c0_6 = arith.constant 0 : index
    %c0_7 = arith.constant 0 : index
    %10 = vector.load %arg5[%c0_6, %c0_7] : memref<32x32xbf16, #tpu.memory_space<vmem>>, vector<32x32xbf16>
    %cst_8 = arith.constant dense<0.000000e+00> : vector<32x32xf32>
    %11 = tpu.matmul %9, %10, %cst_8 {dimension_numbers = #tpu.dot_dimension_numbers<[1], [0], [0], [1], [0, 0, 1, 1], [], []>} : vector<32x32xbf16>, vector<32x32xbf16>, vector<32x32xf32> -> vector<32x32xf32>
    %c0_9 = arith.constant 0 : index
    %c0_10 = arith.constant 0 : index
    %12 = vector.load %arg6[%c0_9, %c0_10] : memref<1x32xf32, #tpu.memory_space<vmem>>, vector<1x32xf32>
    %13 = vector.broadcast %12 : vector<1x32xf32> to vector<32x32xf32>
    %14 = arith.addf %11, %13 : vector<32x32xf32>
    %cst_11 = arith.constant 0.000000e+00 : f32
    %15 = vector.broadcast %cst_11 : f32 to vector<32x32xf32>
    %16 = arith.maximumf %14, %15 : vector<32x32xf32>
    %17 = arith.truncf %16 : vector<32x32xf32> to vector<32x32xbf16>
    %c0_12 = arith.constant 0 : index
    %c0_13 = arith.constant 0 : index
    %18 = vector.load %arg7[%c0_12, %c0_13] : memref<32x128xbf16, #tpu.memory_space<vmem>>, vector<32x128xbf16>
    %cst_14 = arith.constant dense<0.000000e+00> : vector<32x128xf32>
    %19 = tpu.matmul %17, %18, %cst_14 {dimension_numbers = #tpu.dot_dimension_numbers<[1], [0], [0], [1], [0, 0, 1, 1], [], []>} : vector<32x32xbf16>, vector<32x128xbf16>, vector<32x128xf32> -> vector<32x128xf32>
    %20 = vector.extract_strided_slice %19 {offsets = [0, 0], sizes = [32, 4], strides = [1, 1]} : vector<32x128xf32> to vector<32x4xf32>
    %c0_15 = arith.constant 0 : index
    %c0_16 = arith.constant 0 : index
    %21 = vector.load %arg8[%c0_15, %c0_16] : memref<1x4xf32, #tpu.memory_space<vmem>>, vector<1x4xf32>
    %22 = vector.broadcast %21 : vector<1x4xf32> to vector<32x4xf32>
    %23 = arith.addf %20, %22 : vector<32x4xf32>
    %c0_17 = arith.constant 0 : index
    %c0_18 = arith.constant 0 : index
    %24 = vector.load %arg2[%c0_17, %c0_18] : memref<32x4xf32, #tpu.memory_space<vmem>>, vector<32x4xf32>
    %25 = arith.addf %23, %24 : vector<32x4xf32>
    %26 = arith.negf %25 : vector<32x4xf32>
    %27 = math.exp %26 : vector<32x4xf32>
    %cst_19 = arith.constant 1.000000e+00 : f32
    %28 = vector.broadcast %cst_19 : f32 to vector<32x4xf32>
    %29 = arith.addf %28, %27 : vector<32x4xf32>
    %30 = arith.divf %28, %29 : vector<32x4xf32>
    %c0_20 = arith.constant 0 : index
    %c0_21 = arith.constant 0 : index
    %31 = vector.load %arg11[%c0_20, %c0_21] : memref<32x4xf32, #tpu.memory_space<vmem>>, vector<32x4xf32>
    tpu.vector_store %arg11[%c0_20, %c0_21], %30 {strides = array<i32>} : memref<32x4xf32, #tpu.memory_space<vmem>>, vector<32x4xf32>,
    %c0_22 = arith.constant 0 : index
    %c0_23 = arith.constant 0 : index
    %32 = vector.load %arg9[%c0_22, %c0_23] : memref<32x128xbf16, #tpu.memory_space<vmem>>, vector<32x128xbf16>
    %cst_24 = arith.constant dense<0.000000e+00> : vector<32x128xf32>
    %33 = tpu.matmul %1, %32, %cst_24 {dimension_numbers = #tpu.dot_dimension_numbers<[1], [0], [0], [1], [0, 0, 1, 1], [], []>} : vector<32x32xbf16>, vector<32x128xbf16>, vector<32x128xf32> -> vector<32x128xf32>
    %c0_25 = arith.constant 0 : index
    %c0_26 = arith.constant 0 : index
    %34 = vector.load %arg10[%c0_25, %c0_26] : memref<1x128xf32, #tpu.memory_space<vmem>>, vector<1x128xf32>
    %35 = vector.broadcast %34 : vector<1x128xf32> to vector<32x128xf32>
    %36 = arith.addf %33, %35 : vector<32x128xf32>
    %c0_27 = arith.constant 0 : index
    %c0_28 = arith.constant 0 : index
    %37 = vector.load %arg12[%c0_27, %c0_28] : memref<32x128xf32, #tpu.memory_space<vmem>>, vector<32x128xf32>
    tpu.vector_store %arg12[%c0_27, %c0_28], %36 {strides = array<i32>} : memref<32x128xf32, #tpu.memory_space<vmem>>, vector<32x128xf32>,
    return
  }
  func.func @transform_0(%arg0: i32) -> (i32, i32) {
    %c0_i32 = arith.constant 0 : i32
    %c0_i32_0 = arith.constant 0 : i32
    return %arg0, %c0_i32 : i32, i32
  }
  func.func @transform_1(%arg0: i32) -> (i32, i32) {
    %c0_i32 = arith.constant 0 : i32
    %c0_i32_0 = arith.constant 0 : i32
    return %arg0, %c0_i32 : i32, i32
  }
  func.func @transform_2(%arg0: i32) -> (i32, i32) {
    %c0_i32 = arith.constant 0 : i32
    %c0_i32_0 = arith.constant 0 : i32
    %c0_i32_1 = arith.constant 0 : i32
    return %c0_i32, %c0_i32_0 : i32, i32
  }
  func.func @transform_3(%arg0: i32) -> (i32, i32) {
    %c0_i32 = arith.constant 0 : i32
    %c0_i32_0 = arith.constant 0 : i32
    %c0_i32_1 = arith.constant 0 : i32
    return %c0_i32, %c0_i32_0 : i32, i32
  }
  func.func @transform_4(%arg0: i32) -> (i32, i32) {
    %c0_i32 = arith.constant 0 : i32
    %c0_i32_0 = arith.constant 0 : i32
    %c0_i32_1 = arith.constant 0 : i32
    return %c0_i32, %c0_i32_0 : i32, i32
  }
  func.func @transform_5(%arg0: i32) -> (i32, i32) {
    %c0_i32 = arith.constant 0 : i32
    %c0_i32_0 = arith.constant 0 : i32
    %c0_i32_1 = arith.constant 0 : i32
    return %c0_i32, %c0_i32_0 : i32, i32
  }
  func.func @transform_6(%arg0: i32) -> (i32, i32) {
    %c0_i32 = arith.constant 0 : i32
    %c0_i32_0 = arith.constant 0 : i32
    %c0_i32_1 = arith.constant 0 : i32
    return %c0_i32, %c0_i32_0 : i32, i32
  }
  func.func @transform_7(%arg0: i32) -> (i32, i32) {
    %c0_i32 = arith.constant 0 : i32
    %c0_i32_0 = arith.constant 0 : i32
    %c0_i32_1 = arith.constant 0 : i32
    return %c0_i32, %c0_i32_0 : i32, i32
  }
  func.func @transform_8(%arg0: i32) -> (i32, i32) {
    %c0_i32 = arith.constant 0 : i32
    %c0_i32_0 = arith.constant 0 : i32
    %c0_i32_1 = arith.constant 0 : i32
    return %c0_i32, %c0_i32_0 : i32, i32
  }
  func.func @transform_9(%arg0: i32) -> (i32, i32) {
    %c0_i32 = arith.constant 0 : i32
    %c0_i32_0 = arith.constant 0 : i32
    %c0_i32_1 = arith.constant 0 : i32
    return %c0_i32, %c0_i32_0 : i32, i32
  }
  func.func @transform_10(%arg0: i32) -> (i32, i32) {
    %c0_i32 = arith.constant 0 : i32
    %c0_i32_0 = arith.constant 0 : i32
    return %arg0, %c0_i32 : i32, i32
  }
  func.func @transform_11(%arg0: i32) -> (i32, i32) {
    %c0_i32 = arith.constant 0 : i32
    %c0_i32_0 = arith.constant 0 : i32
    return %arg0, %c0_i32 : i32, i32
  }
}

</mosaic_0001>

<bundles_post_ra>
// kernel: tpu_custom_call.1
= control target key start
LH: loop header
LB: loop body
LE: loop exit
PB: predicated region body
PF: predicated region fallthrough
CT: control target
= control target key end

     0   :  { %17 = vsyncpa [#allocation3], 0  ;;  %s770_s0 = inlined_call_operand.vmem [shape: f32[32,32], index: 0, kind: input, shape index: {}]   ;;  %s771_s1 = inlined_call_operand.vmem [shape: f32[32,4], index: 1, kind: input, shape index: {}]   ;;  %s772_s2 = inlined_call_operand.hbm [shape: bf16[32,32], index: 2, kind: input, shape index: {}]   ;;  %s773_s3 = inlined_call_operand.vmem [shape: f32[1,32], index: 3, kind: input, shape index: {}]   ;;  %s774_s4 = inlined_call_operand.hbm [shape: bf16[32,32], index: 4, kind: input, shape index: {}]   ;;  %s775_s5 = inlined_call_operand.vmem [shape: f32[1,32], index: 5, kind: input, shape index: {}]   ;;  %s776_s6 = inlined_call_operand.hbm [shape: bf16[32,128], index: 6, kind: input, shape index: {}]   ;;  %s777_s7 = inlined_call_operand.vmem [shape: f32[1,4], index: 7, kind: input, shape index: {}]   ;;  %s778_s8 = inlined_call_operand.hbm [shape: bf16[32,128], index: 8, kind: input, shape index: {}]   ;;  %s779_s9 = inlined_call_operand.vmem [shape: f32[1,128], index: 9, kind: input, shape index: {}]   ;;  %s780_s10 = inlined_call_operand.vmem [shape: f32[32,4], index: 10, kind: output, shape index: {0}]   ;;  %s781_s11 = inlined_call_operand.hbm [shape: f32[32,128], index: 11, kind: output, shape index: {1}]  }
   0x1   :  { %18 = vsyncpa [#allocation6], 0 }
   0x2   :  { %19 = vsyncpa [#allocation9], 0 }
   0x3   :  { %20 = vsyncpa [#allocation4], 0  ;;  %s44_s19 = sshll.u32 %s774_s4, 4  ;;  %s626_s20 = smov [#allocation5]   ;;  %s45_s19 = int_to_ptr.hbm [resolvable:$true] %s44_s19 }
   0x4   :  { %s46_s21 = sshll.u32 %s626_s20, 4  ;;  %s29_s24 = sshll.u32 %s772_s2, 4  ;;  %s47_s21 = int_to_ptr.vmem [resolvable:$true] %s46_s21  ;;  %s30_s24 = int_to_ptr.hbm [resolvable:$true] %s29_s24 }
   0x5   :  { %s627_s25 = smov 64   ;;  %s628_s26 = smov 4  }
   0x6   :  { %52 = dma.hbm_to_vmem [thread:$0]  %s45_s19, 256, %s47_s21, [#allocation6], %s627_s25, %s627_s25, %s628_s26  }
   0x7   :  { %s629_s27 = smov [#allocation2]   ;;  %s59_s12 = sshll.u32 %s776_s6, 4  ;;  %s60_s12 = int_to_ptr.hbm [resolvable:$true] %s59_s12 }
   0x8   :  { %s31_s28 = sshll.u32 %s629_s27, 4  ;;  %s74_s14 = sshll.u32 %s778_s8, 4  ;;  %s32_s28 = int_to_ptr.vmem [resolvable:$true] %s31_s28  ;;  %s75_s14 = int_to_ptr.hbm [resolvable:$true] %s74_s14 }
   0x9   :  { %37 = dma.hbm_to_vmem [thread:$0]  %s30_s24, 256, %s32_s28, [#allocation3], %s627_s25, %s627_s25, %s628_s26  }
   0xa   :  { %s630_s15 = smov [#allocation7]   ;;  %s631_s2 = smov [#allocation8]  }
   0xb   :  { %s61_s16 = sshll.u32 %s630_s15, 4  ;;  %s76_s17 = sshll.u32 %s631_s2, 4  ;;  %s62_s16 = int_to_ptr.vmem [resolvable:$true] %s61_s16  ;;  %s77_s17 = int_to_ptr.vmem [resolvable:$true] %s76_s17 }
   0xc   :  { %67 = dma.hbm_to_vmem [thread:$0]  %s60_s12, 256, %s62_s16, [#allocation6], %s627_s25, %s627_s25, %s628_s26  }
   0xd   :  { %82 = dma.hbm_to_vmem [thread:$0]  %s75_s14, 256, %s77_s17, [#allocation9], %s627_s25, %s627_s25, %s628_s26  }
   0xe   :  { %618 = dma.done.wait [#allocation3], 256  }
   0xf   :  { %619 = vsyncadd [#allocation3], 4294967040 }
  0x10   :  { %620 = dma.done.wait [#allocation6], 512  }
  0x11   :  { %621 = vsyncadd [#allocation6], 4294966784 }
  0x12   :  { %622 = dma.done.wait [#allocation9], 256  }
  0x13   :  { %623 = vsyncadd [#allocation9], 4294967040  ;;  %v462_v0 = vld [vmem:[#allocation2 + $0x8] sm:$0xff]  ;;  %v461_v1 = vld [vmem:[#allocation2] sm:$0xff]  ;;  %vm128_vm0 = vcmask 261120   ;;  %s400_s15 = sshll.u32 %s781_s11, 4  ;;  %s401_s15 = int_to_ptr.hbm [resolvable:$true] %s400_s15 }
  0x14   :  { %v102_v2 = vld [vmem:[%s770_s0] sm:$0xff]  ;;  %141 = vmatpush.bf16.msra.mxu0 %v462_v0  ;;  %v103_v3 = vld [vmem:[%s770_s0 + $0x8] sm:$0xff]  ;;  %v104_v5 = vld [vmem:[%s770_s0 + $0x10] sm:$0xff]  ;;  %s633_s11 = smov 128   ;;  %s634_s17 = smov 8   ;;  %vm344_vm4 = vcmask 31744  }
  0x15   :  { %v106_v4 = vpack.c.bf16 %v103_v3, %v102_v2  ;;  %v105_v6 = vld [vmem:[%s770_s0 + $0x18] sm:$0xff]  ;;  %v463_v9 = vld [vmem:[#allocation5] sm:$0xff]  ;;  %v478_v11 = vld [vmem:[%s773_s3] ss:$0 sm:$0xff] }
  0x16   :  { %v107_v7 = vpack.c.bf16 %v105_v6, %v104_v5  ;;  %v464_v8 = vld [vmem:[#allocation5 + $0x8] sm:$0xff]  ;;  %v466_v25 = vld [vmem:[#allocation7 + $0x8] sm:$0xff]  ;;  %v465_v26 = vld [vmem:[#allocation7] sm:$0xff] }
  0x17   :  { %192 = vmatpush.bf16.msra.mxu1 %v464_v8  ;;  %239 = vmatpush.bf16.msra.mxu2 %v466_v25  ;;  %v468_v27 = vld [vmem:[#allocation8 + $0x8] sm:$0xff]  ;;  %v467_v28 = vld [vmem:[#allocation8] sm:$0xff]  ;;  %v479_v30 = vld [vmem:[%s775_s5] ss:$0 sm:$0xff] }
  0x18   :  { %142 = vmatpush.bf16.msra.mxu0 %v461_v1  ;;  %375 = vmatpush.bf16.msra.mxu3 %v468_v27  ;;  %v480_v45 = vld [vmem:[%s777_s7] ss:$0 sm:$0xff]  ;;  %v261_v57 = vld [vmem:[%s771_s1 + $0x8] sm:$0xff]  ;;  %v262_v3 = vld [vmem:[%s771_s1 + $0x10] sm:$0xff] }
  0x19   :  { %v481_v46 = vld [vmem:[%s779_s9] ss:$0 sm:$0xff]  ;;  %s632_s9 = smov [#allocation10]  }
  0x1a   :  { %v260_v51 = vld [vmem:[%s771_s1] sm:$0xff]  ;;  %s398_s4 = sshll.u32 %s632_s9, 4  ;;  %s399_s4 = int_to_ptr.vmem [resolvable:$true] %s398_s4 }
  0x1b   :  { %425 = vmatmul.msk.bf16.vlgmr.msra.gmra.mxu0 %vm128_vm0, %v106_v4  ;;  %193 = vmatpush.bf16.msra.mxu1 %v463_v9 }
  0x1c   :  { %240 = vmatpush.bf16.msra.mxu2 %v465_v26  ;;  %376 = vmatpush.bf16.msra.mxu3 %v467_v28 }
  0x1f   :  { %459 = vmatmul.msk.bf16.vlgmr.msra.gmra.mxu3 %vm128_vm0, %v106_v4 }
  0x2b   :  { %426 = vmatmul.msk.bf16.gmra.mxu0 %vm128_vm0, %v107_v7 }
  0x2f   :  { %460 = vmatmul.msk.bf16.gmra.mxu3 %vm128_vm0, %v107_v7 }
  0x98   :  { %v144_v10 = vpop.f32.mrf.mxu0 }
  0x99   :  { %v145_v12 = vadd.f32 %v478_v11, %v144_v10 }
  0x9b   :  { %v154_v15 = vmax.f32 %v145_v12, 0.0  ;;  %v263_v12 = vld [vmem:[%s771_s1 + $0x18] sm:$0xff] }
  0xa0   :  { %v146_v13 = vpop.f32.mrf.mxu0 }
  0xa1   :  { %v147_v14 = vadd.f32 %v478_v11, %v146_v13 }
  0xa2   :  { %v378_v44 = vpop.f32.mrf.mxu3 }
  0xa3   :  { %v155_v16 = vmax.f32 %v147_v14, 0.0  ;;  %v379_v48 = vadd.f32 %v481_v46, %v378_v44 }
  0xa5   :  { %v158_v17 = vpack.c.bf16 %v155_v16, %v154_v15  ;;  %388 = vst [vmem:[#allocation10] sm:$0xff] %v379_v48 }
  0xa7   :  { %435 = vmatmul.msk.bf16.vlgmr.msra.gmra.mxu1 %vm128_vm0, %v158_v17 }
  0xa8   :  { %v149_v18 = vpop.f32.mrf.mxu0 }
  0xa9   :  { %v150_v19 = vadd.f32 %v478_v11, %v149_v18 }
  0xaa   :  { %v380_v47 = vpop.f32.mrf.mxu3 }
  0xab   :  { %v156_v22 = vmax.f32 %v150_v19, 0.0  ;;  %v381_v49 = vadd.f32 %v481_v46, %v380_v47 }
  0xad   :  { %389 = vst [vmem:[#allocation10 + $0x8] sm:$0xff] %v381_v49 }
  0xb0   :  { %v151_v20 = vpop.f32.mrf.mxu0 }
  0xb1   :  { %v152_v21 = vadd.f32 %v478_v11, %v151_v20 }
  0xb2   :  { %v383_v55 = vpop.f32.mrf.mxu3 }
  0xb3   :  { %v157_v23 = vmax.f32 %v152_v21, 0.0  ;;  %v384_v0 = vadd.f32 %v481_v46, %v383_v55 }
  0xb5   :  { %v159_v24 = vpack.c.bf16 %v157_v23, %v156_v22  ;;  %390 = vst [vmem:[#allocation10 + $0x10] sm:$0xff] %v384_v0 }
  0xb7   :  { %436 = vmatmul.msk.bf16.gmra.mxu1 %vm128_vm0, %v159_v24 }
  0xba   :  { %v385_v63 = vpop.f32.mrf.mxu3 }
  0xbb   :  { %v386_v1 = vadd.f32 %v481_v46, %v385_v63 }
  0xbd   :  { %391 = vst [vmem:[#allocation10 + $0x18] sm:$0xff] %v386_v1 }
  0xbe   :  { %406 = dma.vmem_to_hbm [thread:$0]  %s399_s4, 512, %s401_s15, [#allocation4], %s633_s11, %s633_s11, %s634_s17  }
 0x124   :  { %v195_v29 = vpop.f32.mrf.mxu1 }
 0x125   :  { %v196_v31 = vadd.f32 %v479_v30, %v195_v29 }
 0x127   :  { %v205_v34 = vmax.f32 %v196_v31, 0.0 }
 0x12c   :  { %v197_v32 = vpop.f32.mrf.mxu1 }
 0x12d   :  { %v198_v33 = vadd.f32 %v479_v30, %v197_v32 }
 0x12f   :  { %v206_v35 = vmax.f32 %v198_v33, 0.0 }
 0x131   :  { %v209_v36 = vpack.c.bf16 %v206_v35, %v205_v34 }
 0x133   :  { %445 = vmatmul.msk.bf16.vlgmr.msra.gmra.mxu2 %vm128_vm0, %v209_v36 }
 0x134   :  { %v200_v37 = vpop.f32.mrf.mxu1 }
 0x135   :  { %v201_v38 = vadd.f32 %v479_v30, %v200_v37 }
 0x137   :  { %v207_v41 = vmax.f32 %v201_v38, 0.0 }
 0x13c   :  { %v202_v39 = vpop.f32.mrf.mxu1 }
 0x13d   :  { %v203_v40 = vadd.f32 %v479_v30, %v202_v39 }
 0x13f   :  { %v208_v42 = vmax.f32 %v203_v40, 0.0 }
 0x141   :  { %v210_v43 = vpack.c.bf16 %v208_v42, %v207_v41 }
 0x143   :  { %446 = vmatmul.msk.bf16.gmra.mxu2 %vm128_vm0, %v210_v43 }
 0x1b6   :  { %v242_v50 = vpop.f32.mrf.mxu2 }
 0x1b7   :  { %v256_v52 = vadd.f32 %v480_v45, %v242_v50 }
 0x1b9   :  { %v264_v53 = vadd.f32 %v260_v51, %v256_v52 }
 0x1bb   :  { %v447_v54 = vmul.f32 -1.442695, %v264_v53 }
 0x1bd   :  { %482 = vpow2.f32 %v447_v54 }
 0x1be   :  { %v244_v56 = vpop.f32.mrf.mxu2 }
 0x1bf   :  { %v257_v58 = vadd.f32 %v480_v45, %v244_v56 }
 0x1c1   :  { %v265_v59 = vadd.f32 %v261_v57, %v257_v58 }
 0x1c3   :  { %v483_v60 = vpop.eup %482  ;;  %v448_v61 = vmul.f32 -1.442695, %v265_v59 }
 0x1c4   :  { %v280_v62 = vadd.f32 1.0, %v483_v60 }
 0x1c5   :  { %484 = vpow2.f32 %v448_v61 }
 0x1c6   :  { %486 = vrcp.f32 %v280_v62  ;;  %v247_v2 = vpop.f32.mrf.mxu2  ;;  %v295_v15 = vand.u32 2147483648, %v280_v62  ;;  %v293_v17 = vand.u32 2147483647, %v280_v62  ;;  %vm289_vm2 = vweird.f32 %v280_v62 }
 0x1c7   :  { %v258_v4 = vadd.f32 %v480_v45, %v247_v2 }
 0x1c8   :  { %v296_v23 = vor.u32 1.1754944e-38, %v295_v15  ;;  %vm294_vm5 = vcmp.eq.f32.partialorder %v293_v17, 8.507059e+37 }
 0x1c9   :  { %v266_v5 = vadd.f32 %v262_v3, %v258_v4 }
 0x1cb   :  { %v485_v6 = vpop.eup %484  ;;  %v449_v7 = vmul.f32 -1.442695, %v266_v5 }
 0x1cc   :  { %v487_v8 = vpop.eup %486  ;;  %v281_v9 = vadd.f32 1.0, %v485_v6 }
 0x1cd   :  { %v285_v10 = vmul.f32 %v487_v8, %v280_v62  ;;  %488 = vpow2.f32 %v449_v7  ;;  %vm290_vm1 = vweird.f32 %v487_v8 }
 0x1ce   :  { %490 = vrcp.f32 %v281_v9  ;;  %v249_v11 = vpop.f32.mrf.mxu2  ;;  %vm291_vm3 = vmor %vm289_vm2, %vm290_vm1  ;;  %v310_v29 = vand.u32 2147483648, %v281_v9  ;;  %v308_v31 = vand.u32 2147483647, %v281_v9  ;;  %vm304_vm7 = vweird.f32 %v281_v9 }
 0x1cf   :  { %v286_v13 = vsub.f32 1.0, %v285_v10  ;;  %v259_v14 = vadd.f32 %v480_v45, %v249_v11 }
 0x1d0   :  { %v311_v35 = vor.u32 1.1754944e-38, %v310_v29  ;;  %vm309_vm9 = vcmp.eq.f32.partialorder %v308_v31, 8.507059e+37 }
 0x1d1   :  { %v287_v16 = vmul.f32 %v487_v8, %v286_v13  ;;  %v267_v18 = vadd.f32 %v263_v12, %v259_v14 }
 0x1d3   :  { %v489_v19 = vpop.eup %488  ;;  %v288_v20 = vadd.f32 %v487_v8, %v287_v16  ;;  %v450_v21 = vmul.f32 -1.442695, %v267_v18 }
 0x1d4   :  { %v491_v22 = vpop.eup %490  ;;  %v282_v24 = vadd.f32 1.0, %v489_v19 }
 0x1d5   :  { %v292_v25 = vsel %vm291_vm3, %v487_v8, %v288_v20  ;;  %v300_v26 = vmul.f32 %v491_v22, %v281_v9  ;;  %492 = vpow2.f32 %v450_v21  ;;  %vm305_vm6 = vweird.f32 %v491_v22 }
 0x1d6   :  { %v297_v27 = vsel %vm294_vm5, %v296_v23, %v292_v25  ;;  %494 = vrcp.f32 %v282_v24  ;;  %vm306_vm8 = vmor %vm304_vm7, %vm305_vm6  ;;  %v325_v41 = vand.u32 2147483648, %v282_v24  ;;  %v323_v43 = vand.u32 2147483647, %v282_v24 }
 0x1d7   :  { %345 = vst.msk [vmem:[%s780_s10] sm:$0xff] %vm344_vm4, %v297_v27  ;;  %v301_v28 = vsub.f32 1.0, %v300_v26  ;;  %vm319_vm11 = vweird.f32 %v282_v24 }
 0x1d8   :  { %v326_v46 = vor.u32 1.1754944e-38, %v325_v41  ;;  %vm324_vm13 = vcmp.eq.f32.partialorder %v323_v43, 8.507059e+37 }
 0x1d9   :  { %v302_v30 = vmul.f32 %v491_v22, %v301_v28 }
 0x1db   :  { %v493_v32 = vpop.eup %492  ;;  %v303_v33 = vadd.f32 %v491_v22, %v302_v30 }
 0x1dc   :  { %v495_v34 = vpop.eup %494  ;;  %v283_v36 = vadd.f32 1.0, %v493_v32 }
 0x1dd   :  { %v307_v37 = vsel %vm306_vm8, %v491_v22, %v303_v33  ;;  %v315_v38 = vmul.f32 %v495_v34, %v282_v24  ;;  %vm320_vm10 = vweird.f32 %v495_v34 }
 0x1de   :  { %v312_v39 = vsel %vm309_vm9, %v311_v35, %v307_v37  ;;  %496 = vrcp.f32 %v283_v36  ;;  %vm321_vm12 = vmor %vm319_vm11, %vm320_vm10  ;;  %v340_v51 = vand.u32 2147483648, %v283_v36  ;;  %v338_v53 = vand.u32 2147483647, %v283_v36 }
 0x1df   :  { %346 = vst.msk [vmem:[%s780_s10 + $0x8] sm:$0xff] %vm344_vm4, %v312_v39  ;;  %v316_v40 = vsub.f32 1.0, %v315_v38  ;;  %vm334_vm15 = vweird.f32 %v283_v36 }
 0x1e0   :  { %v341_v55 = vor.u32 1.1754944e-38, %v340_v51  ;;  %vm339_vm1 = vcmp.eq.f32.partialorder %v338_v53, 8.507059e+37 }
 0x1e1   :  { %v317_v42 = vmul.f32 %v495_v34, %v316_v40 }
 0x1e3   :  { %v318_v44 = vadd.f32 %v495_v34, %v317_v42 }
 0x1e4   :  { %v497_v45 = vpop.eup %496 }
 0x1e5   :  { %v322_v47 = vsel %vm321_vm12, %v495_v34, %v318_v44  ;;  %v330_v48 = vmul.f32 %v497_v45, %v283_v36  ;;  %vm335_vm14 = vweird.f32 %v497_v45 }
 0x1e6   :  { %v327_v49 = vsel %vm324_vm13, %v326_v46, %v322_v47  ;;  %vm336_vm0 = vmor %vm334_vm15, %vm335_vm14 }
 0x1e7   :  { %347 = vst.msk [vmem:[%s780_s10 + $0x10] sm:$0xff] %vm344_vm4, %v327_v49  ;;  %v331_v50 = vsub.f32 1.0, %v330_v48 }
 0x1e9   :  { %v332_v52 = vmul.f32 %v497_v45, %v331_v50 }
 0x1eb   :  { %v333_v54 = vadd.f32 %v497_v45, %v332_v52 }
 0x1ed   :  { %v337_v56 = vsel %vm336_vm0, %v497_v45, %v333_v54 }
 0x1ee   :  { %v342_v57 = vsel %vm339_vm1, %v341_v55, %v337_v56 }
 0x1ef   :  { %348 = vst.msk [vmem:[%s780_s10 + $0x18] sm:$0xff] %vm344_vm4, %v342_v57 }
 0x1f0   :  { %624 = dma.done.wait [#allocation4], 512  }
 0x1f1   :  { %625 = vsyncadd [#allocation4], 4294966784 }
 0x1f2   :  { %413 = vsyncpa [#allocation3], 1 }
 0x1f3   :  { %414 = vsyncpa [#allocation6], 1 }
 0x1f4   :  { %415 = vsyncpa [#allocation9], 1 }
 0x1f5   :  { %416 = vsyncpa [#allocation4], 1 }

</bundles_post_ra>
